<compile_context>
chip_gen: v7x
topology: tpu7x:2x2x1
jax: 0.10.0
libtpu: 0.0.40
codegen_flags: <defaults>
</compile_context>

<pallas_src>
import functools

import jax
import jax.numpy as jnp
from jax.experimental import pallas as pl
from jax.experimental.pallas import tpu as pltpu

IN_FEATURES = 1000
N_CLASS = 18
N_AGE = 1
N_OUT = N_CLASS + N_AGE        # 19 (fused head output width)
N_PAD = 128                    # lane-dense padded output width
TB_MAX = 2048                  # batch-tile cap (VMEM-safe on all generations)
SMALL_BATCH_THRESHOLD = 64     # below this, a fused XLA dot beats pallas_call overhead


def _heads_kernel(x_ref, w_ref, b_ref, o_ref):
    # x_ref: (TB, K) f32   w_ref: (K, 128) bf16   b_ref: (1, 128) f32
    # o_ref: (TB, 128) f32
    # In-kernel bf16 cast of the activations: avoids a separate XLA cast pass that
    # would re-read + re-write the whole feature matrix over HBM.
    x = x_ref[...].astype(jnp.bfloat16)
    acc = jnp.dot(x, w_ref[...], preferred_element_type=jnp.float32)
    o_ref[...] = (acc + b_ref[...]).astype(o_ref.dtype)


def prepare_head_params(w_class, b_class, w_age, b_age, dtype=jnp.bfloat16):
    """One-time weight repacking (hoisted out of the per-call path).

    PyTorch Linear computes y = x @ W.T + b, so the two head weight matrices are
    transposed and concatenated into one (in_features, 128) lane-dense matrix:
    columns [0:18] = branch_class, column [18] = branch_age_val, rest zero.
    """
    w_cat = jnp.concatenate([w_class.T, w_age.T], axis=1).astype(dtype)
    w_pad = jnp.zeros((IN_FEATURES, N_PAD), dtype).at[:, :N_OUT].set(w_cat)
    b_cat = jnp.concatenate([b_class, b_age]).astype(jnp.float32)
    b_pad = jnp.zeros((1, N_PAD), jnp.float32).at[0, :N_OUT].set(b_cat)
    return w_pad, b_pad


def _select_batch_tile(B, tb_max=TB_MAX):
    """Largest 8-aligned batch tile <= tb_max that still yields >= 2 grid steps
    (so v7x's two TensorCores both pull HBM bandwidth); tiny batches use one
    full-size block (block == full array dim is exempt from 8-divisibility)."""
    if B <= 8:
        return B
    half = -(-B // 2)                    # cdiv(B, 2): force at least 2 grid steps
    half_aligned = ((half + 7) // 8) * 8  # 8-aligned sublane dim
    return min(tb_max, half_aligned)


def heads_fused_padded(feat, w_pad, b_pad):
    """Fused branch_class + branch_age_val. Returns lane-dense (B, 128) f32."""
    B, K = feat.shape
    assert K == IN_FEATURES
    TB = _select_batch_tile(B)
    grid = (pl.cdiv(B, TB),)
    return pl.pallas_call(
        _heads_kernel,
        out_shape=jax.ShapeDtypeStruct((B, N_PAD), jnp.float32),
        grid=grid,
        in_specs=[
            pl.BlockSpec((TB, K), lambda i: (i, 0)),      # activations: tiled over batch
            pl.BlockSpec((K, N_PAD), lambda i: (0, 0)),   # weights: resident across grid
            pl.BlockSpec((1, N_PAD), lambda i: (0, 0)),   # bias: resident across grid
        ],
        out_specs=pl.BlockSpec((TB, N_PAD), lambda i: (i, 0)),
        compiler_params=pltpu.CompilerParams(
            dimension_semantics=("parallel",),            # shard batch across v7x's 2 TCs
            vmem_limit_bytes=28 * 1024 * 1024,            # explicit budget / headroom doc
        ),
    )(feat, w_pad, b_pad)


@functools.partial(jax.jit, static_argnames=("force_pallas",))
def single_output_heads(feat, w_pad, b_pad, force_pallas=False):
    """SingleOutputModel forward downstream of the backbone features."""
    B = feat.shape[0]
    if force_pallas or B >= SMALL_BATCH_THRESHOLD:
        out = heads_fused_padded(feat, w_pad, b_pad)
    else:
        # Tiny batches: fixed pallas_call / grid-step overhead dominates the sub-us of
        # real work; a plain fused XLA dot (same repacked weights) is strictly faster.
        out = jnp.dot(feat.astype(jnp.bfloat16), w_pad,
                      preferred_element_type=jnp.float32) + b_pad
    out_class = out[:, :N_CLASS]
    out_age = out[:, N_CLASS:N_OUT]
    return out_class, out_age


def _init_linear(key, out_f, in_f):
    # Deterministic init mimicking torch.nn.Linear default (uniform +/- 1/sqrt(in_f)).
    kw, kb = jax.random.split(key)
    bound = 1.0 / (in_f ** 0.5)
    w = jax.random.uniform(kw, (out_f, in_f), jnp.float32, -bound, bound)
    b = jax.random.uniform(kb, (out_f,), jnp.float32, -bound, bound)
    return w, b


if __name__ == "__main__":
    key = jax.random.PRNGKey(0)
    k_feat, k_cls, k_age, k_big = jax.random.split(key, 4)

    w_class, b_class = _init_linear(k_cls, N_CLASS, IN_FEATURES)
    w_age, b_age = _init_linear(k_age, N_AGE, IN_FEATURES)

    # One-time parameter prep (cached outside the hot path).
    w_pad, b_pad = prepare_head_params(w_class, b_class, w_age, b_age)

    def ref_heads(f):
        return f @ w_class.T + b_class, f @ w_age.T + b_age

    # --- Small batch (B=2), Pallas path forced so the kernel itself is exercised ---
    B = 2
    feat = jax.random.normal(k_feat, (B, IN_FEATURES), jnp.float32)
    out_class, out_age = single_output_heads(feat, w_pad, b_pad, force_pallas=True)
    out_class, out_age = jax.block_until_ready((out_class, out_age))
    ref_class, ref_age = ref_heads(feat)
    assert out_class.shape == (B, N_CLASS) and out_age.shape == (B, N_AGE)
    assert jnp.allclose(out_class, ref_class, atol=3e-2, rtol=3e-2)
    assert jnp.allclose(out_age, ref_age, atol=3e-2, rtol=3e-2)

    # --- Same small batch through the default dispatch (tiny-batch XLA bypass) ---
    out_class2, out_age2 = jax.block_until_ready(
        single_output_heads(feat, w_pad, b_pad))
    assert jnp.allclose(out_class2, ref_class, atol=3e-2, rtol=3e-2)
    assert jnp.allclose(out_age2, ref_age, atol=3e-2, rtol=3e-2)

    # --- Larger batch (B=200): multi-tile grid (2 steps) + partial final block ---
    B_big = 200
    feat_big = jax.random.normal(k_big, (B_big, IN_FEATURES), jnp.float32)
    out_class_b, out_age_b = jax.block_until_ready(
        single_output_heads(feat_big, w_pad, b_pad))
    ref_class_b, ref_age_b = ref_heads(feat_big)
    assert out_class_b.shape == (B_big, N_CLASS) and out_age_b.shape == (B_big, N_AGE)
    assert jnp.allclose(out_class_b, ref_class_b, atol=3e-2, rtol=3e-2)
    assert jnp.allclose(out_age_b, ref_age_b, atol=3e-2, rtol=3e-2)

    print("KERNEL_OK")
</pallas_src>

<mosaic_0001>
module attributes {stable_mosaic.version = 11 : i64} {
  func.func @_heads_kernel(%arg0: i32, %arg1: memref<2x1000xf32, #tpu.memory_space<vmem>>, %arg2: memref<1000x128xbf16, #tpu.memory_space<vmem>>, %arg3: memref<1x128xf32, #tpu.memory_space<vmem>>, %arg4: memref<2x128xf32, #tpu.memory_space<vmem>>) attributes {dimension_semantics = [#tpu.dimension_semantics<parallel>], iteration_bounds = array<i64: 1>, scalar_prefetch = 0 : i64, scratch_operands = 0 : i64, tpu.core_type = #tpu.core_type<tc>, window_params = [{transform_indices = @transform_0, window_bounds = array<i64: 2, 1000>}, {pipeline_mode = #tpu.pipeline_mode<synchronous>, transform_indices = @transform_1, window_bounds = array<i64: 1000, 128>}, {pipeline_mode = #tpu.pipeline_mode<synchronous>, transform_indices = @transform_2, window_bounds = array<i64: 1, 128>}, {transform_indices = @transform_3, window_bounds = array<i64: 2, 128>}]} {
    %c0 = arith.constant 0 : index
    %c0_0 = arith.constant 0 : index
    %0 = vector.load %arg1[%c0, %c0_0] : memref<2x1000xf32, #tpu.memory_space<vmem>>, vector<2x1000xf32>
    %1 = arith.truncf %0 : vector<2x1000xf32> to vector<2x1000xbf16>
    %c0_1 = arith.constant 0 : index
    %c0_2 = arith.constant 0 : index
    %2 = vector.load %arg2[%c0_1, %c0_2] : memref<1000x128xbf16, #tpu.memory_space<vmem>>, vector<1000x128xbf16>
    %cst = arith.constant dense<0.000000e+00> : vector<2x128xf32>
    %3 = tpu.matmul %1, %2, %cst {dimension_numbers = #tpu.dot_dimension_numbers<[1], [0], [0], [1], [0, 0, 1, 1], [], []>} : vector<2x1000xbf16>, vector<1000x128xbf16>, vector<2x128xf32> -> vector<2x128xf32>
    %c0_3 = arith.constant 0 : index
    %c0_4 = arith.constant 0 : index
    %4 = vector.load %arg3[%c0_3, %c0_4] : memref<1x128xf32, #tpu.memory_space<vmem>>, vector<1x128xf32>
    %5 = vector.broadcast %4 : vector<1x128xf32> to vector<2x128xf32>
    %6 = arith.addf %3, %5 : vector<2x128xf32>
    %c0_5 = arith.constant 0 : index
    %c0_6 = arith.constant 0 : index
    %7 = vector.load %arg4[%c0_5, %c0_6] : memref<2x128xf32, #tpu.memory_space<vmem>>, vector<2x128xf32>
    tpu.vector_store %arg4[%c0_5, %c0_6], %6 {strides = array<i32>} : memref<2x128xf32, #tpu.memory_space<vmem>>, vector<2x128xf32>,
    return
  }
  func.func @transform_0(%arg0: i32) -> (i32, i32) {
    %c0_i32 = arith.constant 0 : i32
    %c0_i32_0 = arith.constant 0 : i32
    return %arg0, %c0_i32 : i32, i32
  }
  func.func @transform_1(%arg0: i32) -> (i32, i32) {
    %c0_i32 = arith.constant 0 : i32
    %c0_i32_0 = arith.constant 0 : i32
    %c0_i32_1 = arith.constant 0 : i32
    return %c0_i32, %c0_i32_0 : i32, i32
  }
  func.func @transform_2(%arg0: i32) -> (i32, i32) {
    %c0_i32 = arith.constant 0 : i32
    %c0_i32_0 = arith.constant 0 : i32
    %c0_i32_1 = arith.constant 0 : i32
    return %c0_i32, %c0_i32_0 : i32, i32
  }
  func.func @transform_3(%arg0: i32) -> (i32, i32) {
    %c0_i32 = arith.constant 0 : i32
    %c0_i32_0 = arith.constant 0 : i32
    return %arg0, %c0_i32 : i32, i32
  }
}

</mosaic_0001>

<bundles_post_ra>
// kernel: single_output_heads.1
= control target key start
LH: loop header
LB: loop body
LE: loop exit
PB: predicated region body
PF: predicated region fallthrough
CT: control target
= control target key end

     0   :  { %8 = vsyncpa [#allocation3], 0  ;;  %s1111_s0 = inlined_call_operand.hbm [shape: f32[2,1000], index: 0, kind: input, shape index: {}]   ;;  %s1112_s1 = inlined_call_operand.hbm [shape: bf16[1000,128], index: 1, kind: input, shape index: {}]   ;;  %s1113_s2 = inlined_call_operand.vmem [shape: f32[1,128], index: 2, kind: input, shape index: {}]   ;;  %s1114_s3 = inlined_call_operand.vmem [shape: f32[2,128], index: 3, kind: output, shape index: {}]  }
   0x1   :  { %9 = vsyncpa [#allocation5], 0  ;;  %s1027_s12 = smov [#allocation2]   ;;  %s1028_s14 = smov [#allocation4]  }
   0x2   :  { %s16_s13 = sshll.u32 %s1027_s12, 4  ;;  %s25_s15 = sshll.u32 %s1028_s14, 4  ;;  %s17_s13 = int_to_ptr.vmem [resolvable:$true] %s16_s13  ;;  %s1053_s15 = int_to_ptr.vmem [resolvable:$true] %s25_s15 }
   0x3   :  { %s979_s18 = scalar_lea.hbm %s1111_s0, 256 }
   0x4   :  { %p980_p0 = scmp.ne.s32.totalorder %s1111_s0, %s979_s18  ;;  %p983_p1 = scmp.lt.u32.totalorder %s979_s18, %s1111_s0 }
   0x6   :  { %p985_p2 = pnand %p983_p1, %p980_p0 }
   0x8   :  { %988 = shalt.err (!%p985_p2)
}
   0x9   :  { %s989_s23 = scalar_lea.vmem %s17_s13, 256  ;;  %p994_p4 = scmp.lt.s32.totalorder %s17_s13, %s17_s13 }
   0xa   :  { %p990_p3 = scmp.ne.s32.totalorder %s17_s13, %s989_s23  ;;  %p995_p5 = scmp.lt.s32.totalorder %s989_s23, %s989_s23 }
   0xc   :  { %p996_p6 = por %p995_p5, %p994_p4 }
   0xe   :  { %p997_p7 = pnand %p996_p6, %p990_p3 }
  0x10   :  { %1000 = shalt.err (!%p997_p7)
}
  0x11   :  { %19 = dma.hbm_to_vmem [thread:$0]  %s1111_s0, 256, %s17_s13, [#allocation3]  }
  0x12   :  { %s1001_s28 = scalar_lea.hbm %s1112_s1, 8000 }
  0x13   :  { %p1002_p8 = scmp.ne.s32.totalorder %s1112_s1, %s1001_s28  ;;  %p1005_p9 = scmp.lt.u32.totalorder %s1001_s28, %s1112_s1 }
  0x15   :  { %p1007_p10 = pnand %p1005_p9, %p1002_p8 }
  0x17   :  { %1010 = shalt.err (!%p1007_p10)
}
  0x18   :  { %s1011_s6 = scalar_lea.vmem %s1053_s15, 8000  ;;  %p1016_p12 = scmp.lt.s32.totalorder %s1053_s15, %s1053_s15 }
  0x19   :  { %p1012_p11 = scmp.ne.s32.totalorder %s1053_s15, %s1011_s6  ;;  %p1017_p13 = scmp.lt.s32.totalorder %s1011_s6, %s1011_s6 }
  0x1b   :  { %p1018_p0 = por %p1017_p13, %p1016_p12 }
  0x1d   :  { %p1019_p1 = pnand %p1018_p0, %p1012_p11 }
  0x1f   :  { %1022 = shalt.err (!%p1019_p1)
}
  0x20   :  { %s1029_s0 = smov 64   ;;  %s1030_s7 = smov 4  }
  0x21   :  { %31 = dma.hbm_to_vmem [thread:$0]  %s1112_s1, 8000, %s1053_s15, [#allocation5], %s1029_s0, %s1029_s0, %s1030_s7  }
  0x22   :  { %1023 = dma.done.wait [#allocation3], 256  }
  0x23   :  { %1024 = vsyncadd [#allocation3], 4294967040 }
  0x24   :  { %1025 = dma.done.wait [#allocation5], 8000  }
  0x25   :  { %1026 = vsyncadd [#allocation5], 4294959296  ;;  %v914_v0 = vld [vmem:[#allocation4 + $0x40] sm:$0xff]   ;;  %v918_v4 = vld [vmem:[#allocation4 + $0x48] sm:$0xff]   ;;  %v1031_v22 = vmov 1983009808   ;;  %v49_v24 = vlaneseq }
  0x26   :  { %v915_v1 = vld [vmem:[#allocation4 + $0xc0] sm:$0xff]   ;;  %842 = vmatprep.subr.bf16.mxu0 %v914_v0  ;;  %v919_v5 = vld [vmem:[#allocation4 + $0xc8] sm:$0xff]   ;;  %v922_v8 = vld [vmem:[#allocation4 + $0x50] sm:$0xff]   ;;  %v47_v23 = vunpack.c.l.s4 %v1031_v22  ;;  %v1032_v42 = vmov 0   ;;  %vm602_vm0 = vcmask 850944   ;;  %vm606_vm1 = vcmask 1043456  }
  0x27   :  { %v916_v2 = vld [vmem:[#allocation4] sm:$0xff]   ;;  %864 = vmatprep.subr.bf16.mxu1 %v915_v1  ;;  %v920_v6 = vld [vmem:[#allocation4 + $0x8] sm:$0xff]   ;;  %v923_v9 = vld [vmem:[#allocation4 + $0xd0] sm:$0xff]   ;;  %v50_v30 = vshrl.u32 %v49_v24, 7 }
  0x28   :  { %v917_v3 = vld [vmem:[#allocation4 + $0x80] sm:$0xff]   ;;  %843 = vmatpush3.bf16.msra.mxu0 %v916_v2  ;;  %v921_v7 = vld [vmem:[#allocation4 + $0x88] sm:$0xff]   ;;  %v924_v10 = vld [vmem:[#allocation4 + $0x10] sm:$0xff]   ;;  %v48_v29 = vunpack.c.0.s8 %v47_v23 }
  0x29   :  { %865 = vmatpush3.bf16.msra.mxu1 %v917_v3  ;;  %844 = vmatprep.subr.bf16.mxu0 %v918_v4  ;;  %v925_v11 = vld [vmem:[#allocation4 + $0x90] sm:$0xff]   ;;  %v926_v12 = vld [vmem:[#allocation4 + $0x58] sm:$0xff]   ;;  %v930_v16 = vld [vmem:[#allocation4 + $0x60] sm:$0xff]  }
  0x2a   :  { %866 = vmatprep.subr.bf16.mxu1 %v919_v5  ;;  %v927_v13 = vld [vmem:[#allocation4 + $0xd8] sm:$0xff]   ;;  %v931_v17 = vld [vmem:[#allocation4 + $0xe0] sm:$0xff]   ;;  %v934_v20 = vld [vmem:[#allocation4 + $0x68] sm:$0xff]   ;;  %v1084_v35 = vsub.s32 %v48_v29, %v50_v30 }
  0x2b   :  { %v928_v14 = vld [vmem:[#allocation4 + $0x18] sm:$0xff]   ;;  %v932_v18 = vld [vmem:[#allocation4 + $0x20] sm:$0xff]   ;;  %v935_v21 = vld [vmem:[#allocation4 + $0xe8] sm:$0xff]  }
  0x2c   :  { %845 = vmatpush3.bf16.msra.mxu0 %v920_v6  ;;  %v929_v15 = vld [vmem:[#allocation4 + $0x98] sm:$0xff]   ;;  %v933_v19 = vld [vmem:[#allocation4 + $0xa0] sm:$0xff]   ;;  %v936_v25 = vld [vmem:[#allocation4 + $0x28] sm:$0xff]  }
  0x2d   :  { %867 = vmatpush3.bf16.msra.mxu1 %v921_v7  ;;  %846 = vmatprep.subr.bf16.mxu0 %v922_v8  ;;  %v937_v26 = vld [vmem:[#allocation4 + $0xa8] sm:$0xff]   ;;  %v938_v27 = vld [vmem:[#allocation4 + $0x70] sm:$0xff]   ;;  %v942_v33 = vld [vmem:[#allocation4 + $0x78] sm:$0xff]  }
  0x2e   :  { %868 = vmatprep.subr.bf16.mxu1 %v923_v9  ;;  %v939_v28 = vld [vmem:[#allocation4 + $0xf0] sm:$0xff]   ;;  %v943_v34 = vld [vmem:[#allocation4 + $0xf8] sm:$0xff]   ;;  %v947_v41 = vld [vmem:[#allocation4 + $0x140] sm:$0xff]  }
  0x2f   :  { %v940_v31 = vld [vmem:[#allocation4 + $0x30] sm:$0xff]   ;;  %v944_v36 = vld [vmem:[#allocation4 + $0x38] sm:$0xff]   ;;  %v948_v48 = vld [vmem:[#allocation4 + $0x100] sm:$0xff]  }
  0x30   :  { %847 = vmatpush3.bf16.msra.mxu0 %v924_v10  ;;  %v941_v32 = vld [vmem:[#allocation4 + $0xb0] sm:$0xff]   ;;  %v945_v37 = vld [vmem:[#allocation4 + $0xb8] sm:$0xff]   ;;  %v950_v50 = vld [vmem:[#allocation4 + $0x148] sm:$0xff]  }
  0x31   :  { %869 = vmatpush3.bf16.msra.mxu1 %v925_v11  ;;  %848 = vmatprep.subr.bf16.mxu0 %v926_v12  ;;  %v41_v38 = vld [vmem:[#allocation2] sm:$0xff]  ;;  %v949_v52 = vld [vmem:[#allocation4 + $0x180] sm:$0xff]   ;;  %v951_v53 = vld [vmem:[#allocation4 + $0x108] sm:$0xff]  }
  0x32   :  { %870 = vmatprep.subr.bf16.mxu1 %v927_v13  ;;  %v52_v39 = vrot.slane %v41_v38, %v1084_v35  ;;  %v45_v40 = vcombine.high %v41_v38, %v41_v38  ;;  %v953_v54 = vld [vmem:[#allocation4 + $0x150] sm:$0xff]   ;;  %v952_v55 = vld [vmem:[#allocation4 + $0x188] sm:$0xff]   ;;  %v956_v57 = vld [vmem:[#allocation4 + $0x158] sm:$0xff]  }
  0x33   :  { %v954_v56 = vld [vmem:[#allocation4 + $0x110] sm:$0xff]   ;;  %v957_v59 = vld [vmem:[#allocation4 + $0x118] sm:$0xff]   ;;  %v959_v60 = vld [vmem:[#allocation4 + $0x160] sm:$0xff]  }
  0x34   :  { %849 = vmatpush3.bf16.msra.mxu0 %v928_v14  ;;  %v60_v43 = vcombine.high %v52_v39, %v52_v39  ;;  %v59_v44 = vrot.slane %v45_v40, %v1084_v35  ;;  %v87_v45 = vpack.c.bf16 %v52_v39, %v52_v39  ;;  %v955_v58 = vld [vmem:[#allocation4 + $0x190] sm:$0xff]   ;;  %v958_v61 = vld [vmem:[#allocation4 + $0x198] sm:$0xff]   ;;  %v960_v62 = vld [vmem:[#allocation4 + $0x120] sm:$0xff]  }
  0x35   :  { %871 = vmatpush3.bf16.msra.mxu1 %v929_v15  ;;  %850 = vmatprep.subr.bf16.mxu0 %v930_v16  ;;  %v962_v63 = vld [vmem:[#allocation4 + $0x168] sm:$0xff]   ;;  %v961_v0 = vld [vmem:[#allocation4 + $0x1a0] sm:$0xff]   ;;  %v42_v1 = vld [vmem:[#allocation2 + $0x8] sm:$0xff] }
  0x36   :  { %872 = vmatprep.subr.bf16.mxu1 %v931_v17  ;;  %v88_v46 = vpack.c.bf16 %v60_v43, %v60_v43  ;;  %v61_v47 = vcombine.high %v59_v44, %v59_v44  ;;  %v89_v49 = vpack.c.bf16 %v59_v44, %v59_v44  ;;  %v963_v2 = vld [vmem:[#allocation4 + $0x128] sm:$0xff]   ;;  %v62_v3 = vcombine.high %v42_v1, %v42_v1  ;;  %v965_v5 = vld [vmem:[#allocation4 + $0x170] sm:$0xff]   ;;  %v968_v12 = vld [vmem:[#allocation4 + $0x178] sm:$0xff]  }
  0x37   :  { %v69_v4 = vrot.slane %v42_v1, %v1084_v35  ;;  %v964_v6 = vld [vmem:[#allocation4 + $0x1a8] sm:$0xff]   ;;  %v966_v9 = vld [vmem:[#allocation4 + $0x130] sm:$0xff]   ;;  %v969_v15 = vld [vmem:[#allocation4 + $0x138] sm:$0xff]  }
  0x38   :  { %851 = vmatpush3.bf16.msra.mxu0 %v932_v18  ;;  %642 = vmatprep.mubr.bf16.mxu0 %v88_v46  ;;  %v90_v51 = vpack.c.bf16 %v61_v47, %v61_v47  ;;  %v76_v8 = vrot.slane %v62_v3, %v1084_v35  ;;  %v967_v13 = vld [vmem:[#allocation4 + $0x1b0] sm:$0xff]   ;;  %v970_v16 = vld [vmem:[#allocation4 + $0x1b8] sm:$0xff]   ;;  %v972_v18 = vld [vmem:[#allocation4 + $0x1c0] sm:$0xff]  }
  0x39   :  { %873 = vmatpush3.bf16.msra.mxu1 %v933_v19  ;;  %852 = vmatprep.subr.bf16.mxu0 %v934_v20  ;;  %v77_v7 = vcombine.high %v69_v4, %v69_v4  ;;  %v91_v17 = vpack.c.bf16 %v69_v4, %v69_v4  ;;  %v973_v19 = vld [vmem:[#allocation4 + $0x1c8] sm:$0xff]   ;;  %v974_v20 = vld [vmem:[#allocation4 + $0x1d0] sm:$0xff]   ;;  %v976_v22 = vld [vmem:[#allocation4 + $0x1e0] sm:$0xff]  }
  0x3a   :  { %874 = vmatprep.subr.bf16.mxu1 %v935_v21  ;;  %682 = vmatprep.mubr.bf16.mxu1 %v90_v51  ;;  %v78_v11 = vcombine.high %v76_v8, %v76_v8  ;;  %v975_v21 = vld [vmem:[#allocation4 + $0x1d8] sm:$0xff]   ;;  %v977_v23 = vld [vmem:[#allocation4 + $0x1e8] sm:$0xff]   ;;  %v978_v24 = vld [vmem:[#allocation4 + $0x1f0] ss:$0 sps:$4 sm:$0xff]  }
  0x3b   :  { %v92_v10 = vpack.c.bf16 %v77_v7, %v77_v7 }
  0x3c   :  { %853 = vmatpush3.bf16.msra.mxu0 %v936_v25  ;;  %v94_v14 = vpack.c.bf16 %v78_v11, %v78_v11  ;;  %v608_v25 = vsel %vm606_vm1, %v978_v24, 0 }
  0x3d   :  { %875 = vmatpush3.bf16.msra.mxu1 %v937_v26  ;;  %854 = vmatprep.subr.bf16.mxu0 %v938_v27  ;;  %v93_v26 = vpack.c.bf16 %v76_v8, %v76_v8 }
  0x3e   :  { %876 = vmatprep.subr.bf16.mxu1 %v939_v28  ;;  %v777_v28 = vld [vmem:[%s1113_s2] ss:$0 sm:$0xff] }
  0x40   :  { %855 = vmatpush3.bf16.msra.mxu0 %v940_v31 }
  0x41   :  { %877 = vmatpush3.bf16.msra.mxu1 %v941_v32  ;;  %856 = vmatprep.subr.bf16.mxu0 %v942_v33 }
  0x42   :  { %878 = vmatprep.subr.bf16.mxu1 %v943_v34 }
  0x44   :  { %857 = vmatpush3.bf16.msra.mxu0 %v944_v36 }
  0x45   :  { %879 = vmatpush3.bf16.msra.mxu1 %v945_v37  ;;  %886 = vmatprep.subr.bf16.mxu0 %v947_v41 }
  0x46   :  { %730 = vmatprep.subr.bf16.mxu1 %v1032_v42 }
  0x47   :  { %643 = vmatmul.mubr.bf16.vlgmr.msra.gmra.mrb[0].mxu0 %v87_v45 }
  0x48   :  { %887 = vmatpush3.bf16.msra.mxu0 %v948_v48  ;;  %683 = vmatmul.mubr.bf16.vlgmr.msra.gmra.mrb[0].mxu1 %v89_v49 }
  0x49   :  { %888 = vmatprep.subr.bf16.mxu0 %v950_v50  ;;  %731 = vmatpush1.bf16.msra.mxu1 %v949_v52 }
  0x4a   :  { %732 = vmatprep.subr.bf16.mxu1 %v1032_v42  ;;  %722 = vmatprep.mubr.bf16.mxu0 %v92_v10 }
  0x4b   :  { %841 = vmatprep.mubr.msk.bf16.mxu1 %vm602_vm0, %v94_v14 }
  0x4c   :  { %889 = vmatpush3.bf16.msra.mxu0 %v951_v53 }
  0x4d   :  { %890 = vmatprep.subr.bf16.mxu0 %v953_v54  ;;  %733 = vmatpush1.bf16.msra.mxu1 %v952_v55 }
  0x4e   :  { %734 = vmatprep.subr.bf16.mxu1 %v1032_v42 }
  0x50   :  { %891 = vmatpush3.bf16.msra.mxu0 %v954_v56 }
  0x51   :  { %892 = vmatprep.subr.bf16.mxu0 %v956_v57  ;;  %735 = vmatpush1.bf16.msra.mxu1 %v955_v58 }
  0x52   :  { %736 = vmatprep.subr.bf16.mxu1 %v1032_v42 }
  0x54   :  { %893 = vmatpush3.bf16.msra.mxu0 %v957_v59 }
  0x55   :  { %894 = vmatprep.subr.bf16.mxu0 %v959_v60  ;;  %737 = vmatpush1.bf16.msra.mxu1 %v958_v61 }
  0x56   :  { %738 = vmatprep.subr.bf16.mxu1 %v1032_v42 }
  0x58   :  { %895 = vmatpush3.bf16.msra.mxu0 %v960_v62 }
  0x59   :  { %896 = vmatprep.subr.bf16.mxu0 %v962_v63  ;;  %739 = vmatpush1.bf16.msra.mxu1 %v961_v0 }
  0x5a   :  { %740 = vmatprep.subr.bf16.mxu1 %v1032_v42 }
  0x5c   :  { %897 = vmatpush3.bf16.msra.mxu0 %v963_v2 }
  0x5d   :  { %898 = vmatprep.subr.bf16.mxu0 %v965_v5  ;;  %741 = vmatpush1.bf16.msra.mxu1 %v964_v6 }
  0x5e   :  { %742 = vmatprep.subr.bf16.mxu1 %v1032_v42 }
  0x60   :  { %899 = vmatpush3.bf16.msra.mxu0 %v966_v9 }
  0x61   :  { %900 = vmatprep.subr.bf16.mxu0 %v968_v12  ;;  %743 = vmatpush1.bf16.msra.mxu1 %v967_v13 }
  0x62   :  { %744 = vmatprep.subr.bf16.mxu1 %v1032_v42 }
  0x64   :  { %901 = vmatpush3.bf16.msra.mxu0 %v969_v15 }
  0x65   :  { %745 = vmatpush1.bf16.msra.mxu1 %v970_v16 }
  0x66   :  { %746 = vmatprep.subr.bf16.mxu1 %v1032_v42 }
  0x67   :  { %723 = vmatmul.mubr.bf16.vlgmr.msra.gmra.mrb[4].mxu0 %v91_v17 }
  0x69   :  { %747 = vmatpush1.bf16.msra.mxu1 %v972_v18 }
  0x6a   :  { %748 = vmatprep.subr.bf16.mxu1 %v1032_v42 }
  0x6d   :  { %749 = vmatpush1.bf16.msra.mxu1 %v973_v19 }
  0x6e   :  { %750 = vmatprep.subr.bf16.mxu1 %v1032_v42 }
  0x71   :  { %751 = vmatpush1.bf16.msra.mxu1 %v974_v20 }
  0x72   :  { %752 = vmatprep.subr.bf16.mxu1 %v1032_v42 }
  0x75   :  { %753 = vmatpush1.bf16.msra.mxu1 %v975_v21 }
  0x76   :  { %754 = vmatprep.subr.bf16.mxu1 %v1032_v42 }
  0x79   :  { %755 = vmatpush1.bf16.msra.mxu1 %v976_v22 }
  0x7a   :  { %756 = vmatprep.subr.bf16.mxu1 %v1032_v42 }
  0x7d   :  { %757 = vmatpush1.bf16.msra.mxu1 %v977_v23 }
  0x7e   :  { %758 = vmatprep.subr.bf16.mxu1 %v1032_v42 }
  0x81   :  { %759 = vmatpush1.bf16.msra.mxu1 %v608_v25 }
  0x84   :  { %763 = vmatmul.mubr.bf16.vlgmr.msra.gmra.mrb[4].mxu1 %v93_v26 }
 0x11a   :  { %v858_v27 = vpop.f32.mrb[0].mxu0 }
 0x11b   :  { %v859_v29 = vpop.f32.mrb[1].mxu0  ;;  %v880_v30 = vpop.f32.mrb[0].mxu1 }
 0x11c   :  { %v860_v31 = vadd.f32 %v859_v29, %v858_v27  ;;  %v861_v32 = vpop.f32.mrb[2].mxu0  ;;  %v881_v33 = vpop.f32.mrb[1].mxu1 }
 0x11d   :  { %v862_v34 = vpop.f32.mrb[3].mxu0  ;;  %v882_v36 = vadd.f32 %v881_v33, %v880_v30  ;;  %v883_v37 = vpop.f32.mrb[2].mxu1 }
 0x11e   :  { %v645_v35 = vadd.f32 %v860_v31, %v777_v28  ;;  %v884_v38 = vpop.f32.mrb[3].mxu1 }
 0x120   :  { %v685_v39 = vadd.f32 %v882_v36, %v645_v35 }
 0x13a   :  { %v902_v40 = vpop.f32.mrb[4].mxu0 }
 0x13b   :  { %v903_v41 = vpop.f32.mrb[5].mxu0 }
 0x13c   :  { %v904_v42 = vadd.f32 %v903_v41, %v902_v40  ;;  %v905_v43 = vpop.f32.mrb[6].mxu0 }
 0x13d   :  { %v906_v44 = vpop.f32.mrb[7].mxu0 }
 0x13e   :  { %v725_v45 = vadd.f32 %v904_v42, %v685_v39 }
 0x157   :  { %v764_v46 = vpop.f32.mrb[4].mxu1 }
 0x158   :  { %v765_v47 = vadd.f32 %v764_v46, %v725_v45  ;;  %v766_v48 = vpop.f32.mrb[5].mxu1 }
 0x159   :  { %v767_v49 = vpop.f32.mrb[6].mxu1 }
 0x15a   :  { %770 = vst [vmem:[%s1114_s3] sm:$0x3] %v765_v47  ;;  %v768_v50 = vpop.f32.mrb[7].mxu1 }
 0x15b   :  { %775 = vsyncpa [#allocation3], 1 }
 0x15c   :  { %776 = vsyncpa [#allocation5], 1 }

</bundles_post_ra>
